<compile_context>
chip_gen: v7x
topology: tpu7x:2x2x1
jax: 0.10.0
libtpu: 0.0.40
codegen_flags: <defaults>
</compile_context>

<pallas_src>
import math
import jax
import jax.numpy as jnp
from jax.experimental import pallas as pl
from jax.experimental.pallas import tpu as pltpu

_LANE = 128
_TWO_PI = 2.0 * math.pi


# ---------------- activation helpers (exact PyTorch definitions) ----------------
def _hardswish(x):
    # x * relu6(x + 3) / 6
    return x * jnp.clip(x + 3.0, 0.0, 6.0) * (1.0 / 6.0)


def _softplus(x):
    # PyTorch Softplus(beta=1, threshold=20); exp arg clamped so the masked branch
    # never produces inf (padding rows stay finite).
    return jnp.where(x > 20.0, x, jnp.log1p(jnp.exp(jnp.minimum(x, 20.0))))


# ---------------- Pallas kernel ----------------
def complex_pref_kernel(xxT_ref, wtT_ref, btT_ref, whT_ref, bhT_ref, out_ref):
    """ComplexPreference forward for one batch tile, batch on the lane axis.

    xxT_ref : (in_dim, 2*bm)      VMEM   columns [0:bm]=x tile, [bm:2bm]=x' tile
    wtT_ref : (branch, in_dim)    VMEM   trunk weight, transposed
    btT_ref : (branch, 1)         VMEM   trunk bias column
    whT_ref : (2*half, branch)    VMEM   [Wr | Wa]^T fused head weight (act_dtype)
    bhT_ref : (2*half, 1)         VMEM   [br | ba]^T fused head bias column
    out_ref : (1, bm)             VMEM   lane-dense row of per-example scores
    """
    bm = out_ref.shape[1]
    half = whT_ref.shape[0] // 2
    act_dtype = whT_ref.dtype  # f32 default; bf16 on v6e/v7x if requested

    # Trunk for BOTH x and x' in one matmul (they share the lane axis).
    hT = jnp.dot(wtT_ref[...], xxT_ref[...],
                 preferred_element_type=jnp.float32) + btT_ref[...]     # (branch, 2*bm)
    hT = _hardswish(_hardswish(hT.astype(act_dtype)))                   # trunk HS + extra HS

    # Fused radii|angles head: one (2*half, 2*bm) matmul.
    raT = jnp.dot(whT_ref[...], hT,
                  preferred_element_type=jnp.float32) + bhT_ref[...]    # (2*half, 2*bm)
    raT = _softplus(raT)

    # Sublane-aligned split (half is a multiple of 8 in the default config).
    rT = raT[:half]                                                      # radii   (half, 2*bm)
    aT = raT[half:] * _TWO_PI                                            # angles  (half, 2*bm)

    # Lane split at bm (multiple of 128 -> aligned): x vs x' columns.
    p = rT[:, :bm] * rT[:, bm:] * jnp.sin(aT[:, :bm] - aT[:, bm:])       # (half, bm)

    # Sublane reduce lands directly on the lane-dense output row.
    out_ref[...] = jnp.sum(p, axis=0, keepdims=True)                     # (1, bm)


# ---------------- wrapper ----------------
def complex_preference(x, x_prime, params, *, bm=1024, act_dtype=jnp.float32):
    """x, x_prime: (B, in_dim) float32.  Returns (B,) float32.

    act_dtype=jnp.bfloat16 is the v6e/v7x fast path (halves the VALU-bound
    hardswish cost); default float32 keeps bit-tight agreement with the reference.
    """
    B, in_dim = x.shape
    wt, bt, wr, br, wa, ba = params
    branch = wt.shape[1]
    half = wr.shape[1]

    # Batch padding to a full lane multiple; tile size is a multiple of 128 and not
    # forced to split the batch (single TC chips prefer one big tile; on v7x a larger
    # batch naturally yields >=2 parallel grid steps for the megacore).
    Bp = -(-B // _LANE) * _LANE
    bm = max(_LANE, (min(bm, Bp) // _LANE) * _LANE)
    Bp = -(-Bp // bm) * bm
    num_tiles = Bp // bm

    pad = Bp - B
    if pad:
        x = jnp.pad(x, ((0, pad), (0, 0)))
        x_prime = jnp.pad(x_prime, ((0, pad), (0, 0)))

    # Transposed, tile-interleaved packing: for tile t, columns [t*2bm : t*2bm+bm] are
    # x's batch columns and [t*2bm+bm : (t+1)*2bm] are x''s. One contiguous, lane-dense
    # (in_dim, 2*bm) DMA per grid step, no in-kernel concat.
    xT = x.T.reshape(in_dim, num_tiles, bm)
    xpT = x_prime.T.reshape(in_dim, num_tiles, bm)
    xxT = jnp.stack([xT, xpT], axis=2).reshape(in_dim, num_tiles * 2 * bm)

    # Transposed weights / column biases.
    wtT = wt.T                                                    # (branch, in_dim)
    btT = bt.reshape(branch, 1)                                   # (branch, 1)
    whT = jnp.concatenate([wr, wa], axis=1).T.astype(act_dtype)   # (2*half, branch)
    bhT = jnp.concatenate([br, ba], axis=1).reshape(2 * half, 1)  # (2*half, 1)

    cost = pl.CostEstimate(
        flops=2 * (2 * Bp) * (in_dim * branch + branch * 2 * half),
        transcendentals=(2 * Bp) * (2 * half) * 2 + Bp * half,   # softplus(exp+log) + sin
        bytes_accessed=4 * (xxT.size + wtT.size + btT.size + bhT.size + Bp)
        + whT.dtype.itemsize * whT.size,
    )

    def resident(i):        # constant index_map: weights/biases stay resident in VMEM
        return (0, 0)

    out = pl.pallas_call(
        complex_pref_kernel,
        out_shape=jax.ShapeDtypeStruct((1, Bp), jnp.float32),
        grid_spec=pltpu.PrefetchScalarGridSpec(
            num_scalar_prefetch=0,
            grid=(num_tiles,),
            in_specs=[
                pl.BlockSpec((in_dim, 2 * bm), lambda i: (0, i)),   # [x | x'] tile
                pl.BlockSpec((branch, in_dim), resident),           # Wt^T
                pl.BlockSpec((branch, 1), resident),                 # bt
                pl.BlockSpec((2 * half, branch), resident),          # [Wr|Wa]^T
                pl.BlockSpec((2 * half, 1), resident),               # [br|ba]
            ],
            out_specs=pl.BlockSpec((1, bm), lambda i: (0, i)),       # lane-dense row
        ),
        compiler_params=pltpu.CompilerParams(
            dimension_semantics=("parallel",)),
        cost_estimate=cost,
    )(xxT, wtT, btT, whT, bhT)

    return out[0, :B]


# ---------------- pure-JAX reference (for correctness check) ----------------
def reference(x, x_prime, params):
    wt, bt, wr, br, wa, ba = params

    def branch_fn(inp):
        h = _hardswish(_hardswish(inp @ wt + bt))
        r = _softplus(h @ wr + br)
        a = _softplus(h @ wa + ba) * _TWO_PI
        return r, a

    r1, a1 = branch_fn(x)
    r2, a2 = branch_fn(x_prime)
    return jnp.sum(r1 * r2 * jnp.sin(a1 - a2), axis=1)


if __name__ == "__main__":
    # Default ComplexPreference config: in_dim=16, factor=2 -> n=32, half=16, branch_size=128
    in_dim = 16
    factor = 2
    n = in_dim * factor
    half = n // 2
    branch_size = 128
    B = 16

    key = jax.random.PRNGKey(0)
    ks = jax.random.split(key, 8)

    # Deterministic synthetic parameters (kaiming-uniform-ish scale).
    def lin(kw, kb, fan_in, fan_out):
        lim = 1.0 / math.sqrt(fan_in)
        w = jax.random.uniform(kw, (fan_in, fan_out), jnp.float32, -lim, lim)
        b = jax.random.uniform(kb, (1, fan_out), jnp.float32, -lim, lim)
        return w, b

    wt, bt = lin(ks[0], ks[1], in_dim, branch_size)       # trunk Linear(in_dim, 128)
    wr, br = lin(ks[2], ks[3], branch_size, half)         # radii_features Linear(128, n//2)
    wa, ba = lin(ks[4], ks[5], branch_size, half)         # angles_features Linear(128, n//2)
    params = (wt, bt, wr, br, wa, ba)

    x = jax.random.normal(ks[6], (B, in_dim), jnp.float32)
    x_prime = jax.random.normal(ks[7], (B, in_dim), jnp.float32)

    out = complex_preference(x, x_prime, params)
    out = jax.block_until_ready(out)

    ref = reference(x, x_prime, params)
    assert out.shape == (B,)
    assert jnp.allclose(out, ref, atol=1e-4, rtol=1e-4), (out, ref)

    print("KERNEL_OK")
</pallas_src>

<mosaic_0001>
module attributes {stable_mosaic.version = 11 : i64} {
  func.func @complex_pref_kernel(%arg0: i32, %arg1: memref<16x256xf32, #tpu.memory_space<vmem>>, %arg2: memref<128x16xf32, #tpu.memory_space<vmem>>, %arg3: memref<128x1xf32, #tpu.memory_space<vmem>>, %arg4: memref<32x128xf32, #tpu.memory_space<vmem>>, %arg5: memref<32x1xf32, #tpu.memory_space<vmem>>, %arg6: memref<1x128xf32, #tpu.memory_space<vmem>>) attributes {dimension_semantics = [#tpu.dimension_semantics<parallel>], iteration_bounds = array<i64: 1>, scalar_prefetch = 0 : i64, scratch_operands = 0 : i64, tpu.core_type = #tpu.core_type<tc>, window_params = [{transform_indices = @transform_0, window_bounds = array<i64: 16, 256>}, {pipeline_mode = #tpu.pipeline_mode<synchronous>, transform_indices = @transform_1, window_bounds = array<i64: 128, 16>}, {pipeline_mode = #tpu.pipeline_mode<synchronous>, transform_indices = @transform_2, window_bounds = array<i64: 128, 1>}, {pipeline_mode = #tpu.pipeline_mode<synchronous>, transform_indices = @transform_3, window_bounds = array<i64: 32, 128>}, {pipeline_mode = #tpu.pipeline_mode<synchronous>, transform_indices = @transform_4, window_bounds = array<i64: 32, 1>}, {transform_indices = @transform_5, window_bounds = array<i64: 1, 128>}]} {
    %c0 = arith.constant 0 : index
    %c0_0 = arith.constant 0 : index
    %0 = vector.load %arg2[%c0, %c0_0] : memref<128x16xf32, #tpu.memory_space<vmem>>, vector<128x16xf32>
    %c0_1 = arith.constant 0 : index
    %c0_2 = arith.constant 0 : index
    %1 = vector.load %arg1[%c0_1, %c0_2] : memref<16x256xf32, #tpu.memory_space<vmem>>, vector<16x256xf32>
    %cst = arith.constant dense<0.000000e+00> : vector<128x256xf32>
    %2 = tpu.matmul %0, %1, %cst {dimension_numbers = #tpu.dot_dimension_numbers<[1], [0], [0], [1], [0, 0, 1, 1], [], []>} : vector<128x16xf32>, vector<16x256xf32>, vector<128x256xf32> -> vector<128x256xf32>
    %c0_3 = arith.constant 0 : index
    %c0_4 = arith.constant 0 : index
    %3 = vector.load %arg3[%c0_3, %c0_4] : memref<128x1xf32, #tpu.memory_space<vmem>>, vector<128x1xf32>
    %4 = vector.broadcast %3 : vector<128x1xf32> to vector<128x256xf32>
    %5 = arith.addf %2, %4 : vector<128x256xf32>
    %cst_5 = arith.constant 3.000000e+00 : f32
    %6 = vector.broadcast %cst_5 : f32 to vector<128x256xf32>
    %7 = arith.addf %5, %6 : vector<128x256xf32>
    %cst_6 = arith.constant 0.000000e+00 : f32
    %cst_7 = arith.constant 6.000000e+00 : f32
    %8 = vector.broadcast %cst_6 : f32 to vector<128x256xf32>
    %9 = arith.maximumf %8, %7 : vector<128x256xf32>
    %10 = vector.broadcast %cst_7 : f32 to vector<128x256xf32>
    %11 = arith.minimumf %10, %9 : vector<128x256xf32>
    %12 = arith.mulf %5, %11 : vector<128x256xf32>
    %cst_8 = arith.constant 0.166666672 : f32
    %13 = vector.broadcast %cst_8 : f32 to vector<128x256xf32>
    %14 = arith.mulf %12, %13 : vector<128x256xf32>
    %cst_9 = arith.constant 3.000000e+00 : f32
    %15 = vector.broadcast %cst_9 : f32 to vector<128x256xf32>
    %16 = arith.addf %14, %15 : vector<128x256xf32>
    %cst_10 = arith.constant 0.000000e+00 : f32
    %cst_11 = arith.constant 6.000000e+00 : f32
    %17 = vector.broadcast %cst_10 : f32 to vector<128x256xf32>
    %18 = arith.maximumf %17, %16 : vector<128x256xf32>
    %19 = vector.broadcast %cst_11 : f32 to vector<128x256xf32>
    %20 = arith.minimumf %19, %18 : vector<128x256xf32>
    %21 = arith.mulf %14, %20 : vector<128x256xf32>
    %cst_12 = arith.constant 0.166666672 : f32
    %22 = vector.broadcast %cst_12 : f32 to vector<128x256xf32>
    %23 = arith.mulf %21, %22 : vector<128x256xf32>
    %c0_13 = arith.constant 0 : index
    %c0_14 = arith.constant 0 : index
    %24 = vector.load %arg4[%c0_13, %c0_14] : memref<32x128xf32, #tpu.memory_space<vmem>>, vector<32x128xf32>
    %cst_15 = arith.constant dense<0.000000e+00> : vector<32x256xf32>
    %25 = tpu.matmul %24, %23, %cst_15 {dimension_numbers = #tpu.dot_dimension_numbers<[1], [0], [0], [1], [0, 0, 1, 1], [], []>} : vector<32x128xf32>, vector<128x256xf32>, vector<32x256xf32> -> vector<32x256xf32>
    %c0_16 = arith.constant 0 : index
    %c0_17 = arith.constant 0 : index
    %26 = vector.load %arg5[%c0_16, %c0_17] : memref<32x1xf32, #tpu.memory_space<vmem>>, vector<32x1xf32>
    %27 = vector.broadcast %26 : vector<32x1xf32> to vector<32x256xf32>
    %28 = arith.addf %25, %27 : vector<32x256xf32>
    %cst_18 = arith.constant 2.000000e+01 : f32
    %29 = vector.broadcast %cst_18 : f32 to vector<32x256xf32>
    %30 = arith.cmpf ogt, %28, %29 : vector<32x256xf32>
    %cst_19 = arith.constant 2.000000e+01 : f32
    %31 = vector.broadcast %cst_19 : f32 to vector<32x256xf32>
    %32 = arith.minimumf %28, %31 : vector<32x256xf32>
    %33 = math.exp %32 : vector<32x256xf32>
    %34 = math.log1p %33 : vector<32x256xf32>
    %35 = arith.select %30, %28, %34 : vector<32x256xi1>, vector<32x256xf32>
    %36 = vector.extract_strided_slice %35 {offsets = [0, 0], sizes = [16, 256], strides = [1, 1]} : vector<32x256xf32> to vector<16x256xf32>
    %37 = vector.extract_strided_slice %35 {offsets = [16, 0], sizes = [16, 256], strides = [1, 1]} : vector<32x256xf32> to vector<16x256xf32>
    %cst_20 = arith.constant 6.28318548 : f32
    %38 = vector.broadcast %cst_20 : f32 to vector<16x256xf32>
    %39 = arith.mulf %37, %38 : vector<16x256xf32>
    %40 = vector.extract_strided_slice %36 {offsets = [0, 0], sizes = [16, 128], strides = [1, 1]} : vector<16x256xf32> to vector<16x128xf32>
    %41 = vector.extract_strided_slice %36 {offsets = [0, 128], sizes = [16, 128], strides = [1, 1]} : vector<16x256xf32> to vector<16x128xf32>
    %42 = arith.mulf %40, %41 : vector<16x128xf32>
    %43 = vector.extract_strided_slice %39 {offsets = [0, 0], sizes = [16, 128], strides = [1, 1]} : vector<16x256xf32> to vector<16x128xf32>
    %44 = vector.extract_strided_slice %39 {offsets = [0, 128], sizes = [16, 128], strides = [1, 1]} : vector<16x256xf32> to vector<16x128xf32>
    %45 = arith.subf %43, %44 : vector<16x128xf32>
    %46 = math.sin %45 : vector<16x128xf32>
    %47 = arith.mulf %42, %46 : vector<16x128xf32>
    %cst_21 = arith.constant dense<0.000000e+00> : vector<128xf32>
    %48 = vector.multi_reduction <add>, %47, %cst_21 [0] : vector<16x128xf32> to vector<128xf32>
    %49 = vector.shape_cast %48 : vector<128xf32> to vector<1x128xf32>
    %c0_22 = arith.constant 0 : index
    %c0_23 = arith.constant 0 : index
    %50 = vector.load %arg6[%c0_22, %c0_23] : memref<1x128xf32, #tpu.memory_space<vmem>>, vector<1x128xf32>
    tpu.vector_store %arg6[%c0_22, %c0_23], %49 {strides = array<i32>} : memref<1x128xf32, #tpu.memory_space<vmem>>, vector<1x128xf32>,
    return
  }
  func.func @transform_0(%arg0: i32) -> (i32, i32) {
    %c0_i32 = arith.constant 0 : i32
    %c0_i32_0 = arith.constant 0 : i32
    return %c0_i32, %arg0 : i32, i32
  }
  func.func @transform_1(%arg0: i32) -> (i32, i32) {
    %c0_i32 = arith.constant 0 : i32
    %c0_i32_0 = arith.constant 0 : i32
    %c0_i32_1 = arith.constant 0 : i32
    return %c0_i32, %c0_i32_0 : i32, i32
  }
  func.func @transform_2(%arg0: i32) -> (i32, i32) {
    %c0_i32 = arith.constant 0 : i32
    %c0_i32_0 = arith.constant 0 : i32
    %c0_i32_1 = arith.constant 0 : i32
    return %c0_i32, %c0_i32_0 : i32, i32
  }
  func.func @transform_3(%arg0: i32) -> (i32, i32) {
    %c0_i32 = arith.constant 0 : i32
    %c0_i32_0 = arith.constant 0 : i32
    %c0_i32_1 = arith.constant 0 : i32
    return %c0_i32, %c0_i32_0 : i32, i32
  }
  func.func @transform_4(%arg0: i32) -> (i32, i32) {
    %c0_i32 = arith.constant 0 : i32
    %c0_i32_0 = arith.constant 0 : i32
    %c0_i32_1 = arith.constant 0 : i32
    return %c0_i32, %c0_i32_0 : i32, i32
  }
  func.func @transform_5(%arg0: i32) -> (i32, i32) {
    %c0_i32 = arith.constant 0 : i32
    %c0_i32_0 = arith.constant 0 : i32
    return %c0_i32, %arg0 : i32, i32
  }
}

</mosaic_0001>

<bundles_post_ra>
// kernel: tpu_custom_call.1
= control target key start
LH: loop header
LB: loop body
LE: loop exit
PB: predicated region body
PF: predicated region fallthrough
CT: control target
= control target key end

     0   :  { %v1279_v5 = vmov 0.0   ;;  %v1280_v6 = vmov 0   ;;  %vm137_vm0 = vcmask 130048   ;;  %s1785_s0 = inlined_call_operand.vmem [shape: f32[16,256], index: 0, kind: input, shape index: {}]   ;;  %s1786_s1 = inlined_call_operand.vmem [shape: f32[128,16], index: 1, kind: input, shape index: {}]   ;;  %s1787_s2 = inlined_call_operand.vmem [shape: f32[128,1], index: 2, kind: input, shape index: {}]   ;;  %s1788_s3 = inlined_call_operand.vmem [shape: f32[32,128], index: 3, kind: input, shape index: {}]   ;;  %s1789_s4 = inlined_call_operand.vmem [shape: f32[32,1], index: 4, kind: input, shape index: {}]   ;;  %s1790_s5 = inlined_call_operand.hbm [shape: f32[1,128], index: 5, kind: output, shape index: {}]  }
   0x1   :  { %v38_v0 = vld [vmem:[%s1785_s0 + $0x8] sm:$0xff]  ;;  %v40_v1 = vld [vmem:[%s1785_s0 + $0x18] sm:$0xff]  ;;  %v37_v2 = vld [vmem:[%s1785_s0] sm:$0xff]  ;;  %250 = vmatprep.mubr.f32.mxu0 %v1279_v5  ;;  %1213 = vset.pattern.permute.xlu0 %v1280_v6 }
   0x2   :  { %v1160_v3 = vpack.c.bf16 %v40_v1, %v38_v0  ;;  %v39_v4 = vld [vmem:[%s1785_s0 + $0x10] sm:$0xff]  ;;  %1214 = vset.pattern.permute.xlu1 %v1280_v6  ;;  %759 = vmatprep.mubr.f32.mxu1 %v1279_v5  ;;  %v21_v8 = vld [vmem:[%s1786_s1] sm:$0xff]  ;;  %v22_v11 = vld [vmem:[%s1786_s1 + $0x8] sm:$0xff] }
   0x3   :  { %v1162_v7 = vpack.c.bf16 %v39_v4, %v37_v2  ;;  %v41_v9 = vld [vmem:[%s1787_s2] sm:$0xff]  ;;  %v43_v10 = vld [vmem:[%s1787_s2 + $0x10] sm:$0xff]  ;;  %v42_v12 = vld [vmem:[%s1787_s2 + $0x8] sm:$0xff] }
   0x4   :  { %1161 = vmatprep.subr.bf16.mxu0 %v1160_v3  ;;  %59 = vperm.xlu0 %1213, %v41_v9   ;;  %v44_v13 = vld [vmem:[%s1787_s2 + $0x18] sm:$0xff]  ;;  %v23_v14 = vld [vmem:[%s1786_s1 + $0x10] sm:$0xff]  ;;  %v45_v15 = vld [vmem:[%s1787_s2 + $0x20] sm:$0xff] }
   0x5   :  { %1163 = vmatpush1.bf16.msra.mxu0 %v1162_v7  ;;  %69 = vperm.xlu1 %1214, %v43_v10   ;;  %v46_v16 = vld [vmem:[%s1787_s2 + $0x28] sm:$0xff] }
   0x8   :  { %1136 = vmatmul.mubr.msk.f32.vlgmr.msra.gmra.mrb[0].mxu0 %vm137_vm0, %v21_v8  ;;  %64 = vperm.xlu0 %1213, %v42_v12  }
   0x9   :  { %256 = vmatprep.mubr.f32.mxu0 %v1279_v5  ;;  %74 = vperm.xlu1 %1214, %v44_v13  }
   0xc   :  { %1137 = vmatmul.mubr.msk.f32.gmra.mrb[2].mxu0 %vm137_vm0, %v22_v11 }
   0xd   :  { %262 = vmatprep.mubr.f32.mxu0 %v1279_v5 }
   0xe   :  { %10 = vsyncpa [#allocation3], 0  ;;  %79 = vperm.xlu0 %1213, %v45_v15   ;;  %v24_v17 = vld [vmem:[%s1786_s1 + $0x18] sm:$0xff]  ;;  %84 = vperm.xlu1 %1214, %v46_v16   ;;  %v47_v18 = vld [vmem:[%s1787_s2 + $0x30] sm:$0xff] }
   0xf   :  { %v48_v19 = vld [vmem:[%s1787_s2 + $0x38] sm:$0xff]  ;;  %v25_v20 = vld [vmem:[%s1786_s1 + $0x20] sm:$0xff]  ;;  %v50_v22 = vld [vmem:[%s1787_s2 + $0x48] sm:$0xff] }
  0x10   :  { %1138 = vmatmul.mubr.msk.f32.gmra.mrb[4].mxu0 %vm137_vm0, %v23_v14  ;;  %v49_v21 = vld [vmem:[%s1787_s2 + $0x40] sm:$0xff]  ;;  %v26_v23 = vld [vmem:[%s1786_s1 + $0x28] sm:$0xff]  ;;  %v51_v24 = vld [vmem:[%s1787_s2 + $0x50] sm:$0xff] }
  0x11   :  { %268 = vmatprep.mubr.f32.mxu0 %v1279_v5  ;;  %v52_v25 = vld [vmem:[%s1787_s2 + $0x58] sm:$0xff]  ;;  %v27_v26 = vld [vmem:[%s1786_s1 + $0x30] sm:$0xff]  ;;  %v53_v27 = vld [vmem:[%s1787_s2 + $0x60] sm:$0xff] }
  0x12   :  { %89 = vperm.xlu0 %1213, %v47_v18   ;;  %94 = vperm.xlu1 %1214, %v48_v19   ;;  %v54_v28 = vld [vmem:[%s1787_s2 + $0x68] sm:$0xff]  ;;  %v28_v29 = vld [vmem:[%s1786_s1 + $0x38] sm:$0xff]  ;;  %v55_v30 = vld [vmem:[%s1787_s2 + $0x70] sm:$0xff] }
  0x13   :  { %v56_v31 = vld [vmem:[%s1787_s2 + $0x78] sm:$0xff]  ;;  %v29_v32 = vld [vmem:[%s1786_s1 + $0x40] sm:$0xff]  ;;  %v673_v33 = vld [vmem:[%s1789_s4 + $0x10] sm:$0xff] }
  0x14   :  { %1139 = vmatmul.mubr.msk.f32.gmra.mrb[6].mxu0 %vm137_vm0, %v24_v17  ;;  %v674_v34 = vld [vmem:[%s1789_s4 + $0x18] sm:$0xff]  ;;  %v30_v35 = vld [vmem:[%s1786_s1 + $0x48] sm:$0xff]  ;;  %v671_v36 = vld [vmem:[%s1789_s4] sm:$0xff] }
  0x15   :  { %274 = vmatprep.mubr.f32.mxu0 %v1279_v5  ;;  %v672_v37 = vld [vmem:[%s1789_s4 + $0x8] sm:$0xff]  ;;  %v31_v38 = vld [vmem:[%s1786_s1 + $0x50] sm:$0xff]  ;;  %v32_v39 = vld [vmem:[%s1786_s1 + $0x58] sm:$0xff] }
  0x16   :  { %99 = vperm.xlu0 %1213, %v49_v21   ;;  %104 = vperm.xlu1 %1214, %v50_v22   ;;  %v33_v40 = vld [vmem:[%s1786_s1 + $0x60] sm:$0xff]  ;;  %v34_v41 = vld [vmem:[%s1786_s1 + $0x68] sm:$0xff]  ;;  %v35_v42 = vld [vmem:[%s1786_s1 + $0x70] sm:$0xff] }
  0x17   :  { %v36_v43 = vld [vmem:[%s1786_s1 + $0x78] sm:$0xff] }
  0x18   :  { %1140 = vmatmul.mubr.msk.f32.gmra.mrb[8].mxu0 %vm137_vm0, %v25_v20 }
  0x19   :  { %280 = vmatprep.mubr.f32.mxu0 %v1279_v5 }
  0x1a   :  { %109 = vperm.xlu0 %1213, %v51_v24   ;;  %114 = vperm.xlu1 %1214, %v52_v25  }
  0x1c   :  { %1141 = vmatmul.mubr.msk.f32.gmra.mrb[10].mxu0 %vm137_vm0, %v26_v23 }
  0x1d   :  { %286 = vmatprep.mubr.f32.mxu0 %v1279_v5 }
  0x1e   :  { %119 = vperm.xlu0 %1213, %v53_v27   ;;  %124 = vperm.xlu1 %1214, %v54_v28  }
  0x20   :  { %1142 = vmatmul.mubr.msk.f32.gmra.mrb[12].mxu0 %vm137_vm0, %v27_v26 }
  0x21   :  { %292 = vmatprep.mubr.f32.mxu0 %v1279_v5 }
  0x22   :  { %129 = vperm.xlu0 %1213, %v55_v30   ;;  %134 = vperm.xlu1 %1214, %v56_v31  }
  0x24   :  { %1143 = vmatmul.mubr.msk.f32.gmra.mrb[14].mxu0 %vm137_vm0, %v28_v29 }
  0x25   :  { %298 = vmatprep.mubr.f32.mxu0 %v1279_v5 }
  0x26   :  { %687 = vperm.xlu0 %1213, %v673_v33   ;;  %692 = vperm.xlu1 %1214, %v674_v34  }
  0x28   :  { %1144 = vmatmul.mubr.msk.f32.gmra.mrb[16].mxu0 %vm137_vm0, %v29_v32 }
  0x29   :  { %304 = vmatprep.mubr.f32.mxu0 %v1279_v5 }
  0x2a   :  { %677 = vperm.xlu0 %1213, %v671_v36   ;;  %682 = vperm.xlu1 %1214, %v672_v37  }
  0x2c   :  { %1145 = vmatmul.mubr.msk.f32.gmra.mrb[18].mxu0 %vm137_vm0, %v30_v35 }
  0x2d   :  { %310 = vmatprep.mubr.f32.mxu0 %v1279_v5 }
  0x30   :  { %1146 = vmatmul.mubr.msk.f32.gmra.mrb[20].mxu0 %vm137_vm0, %v31_v38 }
  0x31   :  { %316 = vmatprep.mubr.f32.mxu0 %v1279_v5 }
  0x34   :  { %1147 = vmatmul.mubr.msk.f32.gmra.mrb[22].mxu0 %vm137_vm0, %v32_v39 }
  0x35   :  { %322 = vmatprep.mubr.f32.mxu0 %v1279_v5 }
  0x38   :  { %1148 = vmatmul.mubr.msk.f32.gmra.mrb[24].mxu0 %vm137_vm0, %v33_v40 }
  0x39   :  { %328 = vmatprep.mubr.f32.mxu0 %v1279_v5 }
  0x3c   :  { %1149 = vmatmul.mubr.msk.f32.gmra.mrb[26].mxu0 %vm137_vm0, %v34_v41 }
  0x3d   :  { %334 = vmatprep.mubr.f32.mxu0 %v1279_v5 }
  0x40   :  { %1150 = vmatmul.mubr.msk.f32.gmra.mrb[28].mxu0 %vm137_vm0, %v35_v42 }
  0x41   :  { %340 = vmatprep.mubr.f32.mxu0 %v1279_v5 }
  0x44   :  { %1151 = vmatmul.mubr.msk.f32.gmra.mrb[30].mxu0 %vm137_vm0, %v36_v43 }
  0x83   :  { %v60_v44 = vpop.permute.xlu0 %59 }
  0x84   :  { %v70_v56 = vpop.permute.xlu1 %69 }
  0x87   :  { %v65_v50 = vpop.permute.xlu0 %64 }
  0x88   :  { %v75_v11 = vpop.permute.xlu1 %74 }
  0x8d   :  { %v80_v29 = vpop.permute.xlu0 %79 }
  0xdb   :  { %v252_v45 = vpop.f32.mrb[0].mxu0 }
  0xdc   :  { %v253_v46 = vadd.f32 %v252_v45, %v60_v44  ;;  %v254_v47 = vpop.f32.mrb[1].mxu0 }
  0xdd   :  { %v255_v48 = vadd.f32 %v254_v47, %v60_v44 }
  0xde   :  { %v347_v49 = vadd.f32 3.0, %v253_v46 }
  0xdf   :  { %v348_v51 = vadd.f32 3.0, %v255_v48  ;;  %v258_v52 = vpop.f32.mrb[2].mxu0 }
  0xe0   :  { %v379_v53 = vmax.f32 %v347_v49, 0.0  ;;  %v259_v54 = vadd.f32 %v258_v52, %v65_v50  ;;  %v260_v55 = vpop.f32.mrb[3].mxu0 }
  0xe1   :  { %v380_v57 = vmax.f32 %v348_v51, 0.0  ;;  %v261_v58 = vadd.f32 %v260_v55, %v65_v50 }
  0xe2   :  { %v411_v59 = vmin.f32 %v379_v53, 6.0  ;;  %v349_v60 = vadd.f32 3.0, %v259_v54 }
  0xe3   :  { %v412_v61 = vmin.f32 %v380_v57, 6.0  ;;  %v350_v62 = vadd.f32 3.0, %v261_v58  ;;  %v264_v63 = vpop.f32.mrb[4].mxu0 }
  0xe4   :  { %v443_v0 = vmul.f32 %v411_v59, %v253_v46  ;;  %v381_v1 = vmax.f32 %v349_v60, 0.0  ;;  %v265_v2 = vadd.f32 %v264_v63, %v70_v56  ;;  %v266_v3 = vpop.f32.mrb[5].mxu0 }
  0xe5   :  { %v444_v4 = vmul.f32 %v412_v61, %v255_v48  ;;  %v382_v6 = vmax.f32 %v350_v62, 0.0  ;;  %v267_v7 = vadd.f32 %v266_v3, %v70_v56  ;;  %v85_v48 = vpop.permute.xlu1 %84 }
  0xe6   :  { %v1471_v8 = vmul.f32 0.16666667, %v443_v0  ;;  %v413_v9 = vmin.f32 %v381_v1, 6.0  ;;  %v351_v10 = vadd.f32 3.0, %v265_v2 }
  0xe7   :  { %v1473_v12 = vmul.f32 0.16666667, %v444_v4  ;;  %v414_v13 = vmin.f32 %v382_v6, 6.0  ;;  %v352_v14 = vadd.f32 3.0, %v267_v7  ;;  %v270_v15 = vpop.f32.mrb[6].mxu0 }
  0xe8   :  { %v1476_v16 = vadd.f32 3.0, %v1471_v8  ;;  %v445_v17 = vmul.f32 %v413_v9, %v259_v54  ;;  %v383_v18 = vmax.f32 %v351_v10, 0.0  ;;  %v271_v19 = vadd.f32 %v270_v15, %v75_v11  ;;  %v272_v20 = vpop.f32.mrb[7].mxu0 }
  0xe9   :  { %v1479_v21 = vadd.f32 3.0, %v1473_v12  ;;  %v446_v22 = vmul.f32 %v414_v13, %v261_v58  ;;  %v384_v23 = vmax.f32 %v352_v14, 0.0  ;;  %v273_v24 = vadd.f32 %v272_v20, %v75_v11 }
  0xea   :  { %v539_v25 = vmax.f32 %v1476_v16, 0.0  ;;  %v1482_v26 = vmul.f32 0.16666667, %v445_v17  ;;  %v415_v27 = vmin.f32 %v383_v18, 6.0  ;;  %v353_v28 = vadd.f32 3.0, %v271_v19 }
  0xeb   :  { %v1484_v30 = vmul.f32 0.16666667, %v446_v22  ;;  %v416_v31 = vmin.f32 %v384_v23, 6.0  ;;  %v354_v32 = vadd.f32 3.0, %v273_v24  ;;  %v276_v33 = vpop.f32.mrb[8].mxu0  ;;  %v540_v34 = vmax.f32 %v1479_v21, 0.0 }
  0xec   :  { %v1488_v35 = vadd.f32 3.0, %v1482_v26  ;;  %v447_v36 = vmul.f32 %v415_v27, %v265_v2  ;;  %v385_v37 = vmax.f32 %v353_v28, 0.0  ;;  %v277_v38 = vadd.f32 %v276_v33, %v80_v29  ;;  %v278_v39 = vpop.f32.mrb[9].mxu0 }
  0xed   :  { %v1491_v40 = vadd.f32 3.0, %v1484_v30  ;;  %v448_v41 = vmul.f32 %v416_v31, %v267_v7  ;;  %v386_v42 = vmax.f32 %v354_v32, 0.0  ;;  %v279_v43 = vadd.f32 %v278_v39, %v80_v29 }
  0xee   :  { %v541_v44 = vmax.f32 %v1488_v35, 0.0  ;;  %v479_v45 = vmul.f32 0.16666667, %v447_v36  ;;  %v417_v46 = vmin.f32 %v385_v37, 6.0  ;;  %v355_v47 = vadd.f32 3.0, %v277_v38 }
  0xef   :  { %v480_v49 = vmul.f32 0.16666667, %v448_v41  ;;  %v418_v50 = vmin.f32 %v386_v42, 6.0  ;;  %v356_v51 = vadd.f32 3.0, %v279_v43  ;;  %v282_v52 = vpop.f32.mrb[10].mxu0  ;;  %v542_v53 = vmax.f32 %v1491_v40, 0.0  ;;  %v90_v42 = vpop.permute.xlu0 %89 }
  0xf0   :  { %v511_v54 = vadd.f32 3.0, %v479_v45  ;;  %v449_v55 = vmul.f32 %v417_v46, %v271_v19  ;;  %v387_v56 = vmax.f32 %v355_v47, 0.0  ;;  %v283_v57 = vadd.f32 %v282_v52, %v85_v48  ;;  %v284_v58 = vpop.f32.mrb[11].mxu0 }
  0xf1   :  { %v512_v59 = vadd.f32 3.0, %v480_v49  ;;  %v450_v60 = vmul.f32 %v418_v50, %v273_v24  ;;  %v388_v61 = vmax.f32 %v356_v51, 0.0  ;;  %v285_v62 = vadd.f32 %v284_v58, %v85_v48 }
  0xf2   :  { %v543_v63 = vmax.f32 %v511_v54, 0.0  ;;  %v481_v0 = vmul.f32 0.16666667, %v449_v55  ;;  %v419_v1 = vmin.f32 %v387_v56, 6.0  ;;  %v357_v2 = vadd.f32 3.0, %v283_v57 }
  0xf3   :  { %v544_v3 = vmax.f32 %v512_v59, 0.0  ;;  %v482_v4 = vmul.f32 0.16666667, %v450_v60  ;;  %v420_v6 = vmin.f32 %v388_v61, 6.0  ;;  %v358_v7 = vadd.f32 3.0, %v285_v62  ;;  %v288_v9 = vpop.f32.mrb[12].mxu0 }
  0xf4   :  { %v575_v10 = vmin.f32 %v543_v63, 6.0  ;;  %v513_v11 = vadd.f32 3.0, %v481_v0  ;;  %v451_v13 = vmul.f32 %v419_v1, %v277_v38  ;;  %v389_v14 = vmax.f32 %v357_v2, 0.0  ;;  %v290_v15 = vpop.f32.mrb[13].mxu0  ;;  %v95_v1 = vpop.permute.xlu1 %94 }
  0xf5   :  { %v576_v17 = vmin.f32 %v544_v3, 6.0  ;;  %v514_v18 = vadd.f32 3.0, %v482_v4  ;;  %v452_v19 = vmul.f32 %v420_v6, %v279_v43  ;;  %v390_v20 = vmax.f32 %v358_v7, 0.0 }
  0xf6   :  { %v607_v22 = vmul.f32 %v575_v10, %v479_v45  ;;  %v545_v23 = vmax.f32 %v513_v11, 0.0  ;;  %v483_v24 = vmul.f32 0.16666667, %v451_v13  ;;  %v421_v27 = vmin.f32 %v389_v14, 6.0 }
  0xf7   :  { %v608_v28 = vmul.f32 %v576_v17, %v480_v49  ;;  %v546_v29 = vmax.f32 %v514_v18, 0.0  ;;  %v484_v31 = vmul.f32 0.16666667, %v452_v19  ;;  %v422_v32 = vmin.f32 %v390_v20, 6.0  ;;  %v294_v33 = vpop.f32.mrb[14].mxu0 }
  0xf8   :  { %v1495_v36 = vmul.f32 0.16666667, %v607_v22  ;;  %v577_v37 = vmin.f32 %v545_v23, 6.0  ;;  %v515_v39 = vadd.f32 3.0, %v483_v24  ;;  %v453_v38 = vmul.f32 %v421_v27, %v283_v57  ;;  %v296_v41 = vpop.f32.mrb[15].mxu0  ;;  %v105_v35 = vpop.permute.xlu1 %104 }
  0xf9   :  { %v1497_v46 = vmul.f32 0.16666667, %v608_v28  ;;  %v578_v43 = vmin.f32 %v546_v29, 6.0  ;;  %v516_v47 = vadd.f32 3.0, %v484_v31  ;;  %v454_v45 = vmul.f32 %v422_v32, %v285_v62 }
  0xfa   :  { %v609_v48 = vmul.f32 %v577_v37, %v481_v0  ;;  %v547_v50 = vmax.f32 %v515_v39, 0.0  ;;  %v485_v51 = vmul.f32 0.16666667, %v453_v38  ;;  %v289_v49 = vadd.f32 %v288_v9, %v90_v42 }
  0xfb   :  { %v610_v52 = vmul.f32 %v578_v43, %v482_v4  ;;  %v548_v54 = vmax.f32 %v516_v47, 0.0  ;;  %v486_v55 = vmul.f32 0.16666667, %v454_v45  ;;  %v291_v56 = vadd.f32 %v290_v15, %v90_v42  ;;  %v300_v58 = vpop.f32.mrb[16].mxu0 }
  0xfc   :  { %v1499_v59 = vmul.f32 0.16666667, %v609_v48  ;;  %v579_v60 = vmin.f32 %v547_v50, 6.0  ;;  %v517_v57 = vadd.f32 3.0, %v485_v51  ;;  %v359_v61 = vadd.f32 3.0, %v289_v49  ;;  %v1501_v63 = vpop.f32.mrb[17].mxu0 }
  0xfd   :  { %v1503_v2 = vmul.f32 0.16666667, %v610_v52  ;;  %v580_v62 = vmin.f32 %v548_v54, 6.0  ;;  %v518_v0 = vadd.f32 3.0, %v486_v55  ;;  %v360_v3 = vadd.f32 3.0, %v291_v56 }
  0xfe   :  { %v611_v6 = vmul.f32 %v579_v60, %v483_v24  ;;  %v549_v7 = vmax.f32 %v517_v57, 0.0  ;;  %v391_v4 = vmax.f32 %v359_v61, 0.0  ;;  %v295_v9 = vadd.f32 %v294_v33, %v95_v1 }
  0xff   :  { %v612_v10 = vmul.f32 %v580_v62, %v484_v31  ;;  %v550_v11 = vmax.f32 %v518_v0, 0.0  ;;  %v392_v13 = vmax.f32 %v360_v3, 0.0  ;;  %v297_v14 = vadd.f32 %v296_v41, %v95_v1  ;;  %v306_v15 = vpop.f32.mrb[18].mxu0 }
 0x100   :  { %v1505_v17 = vmul.f32 0.16666667, %v611_v6  ;;  %v581_v18 = vmin.f32 %v549_v7, 6.0  ;;  %v423_v19 = vmin.f32 %v391_v4, 6.0  ;;  %v361_v20 = vadd.f32 3.0, %v295_v9  ;;  %v1507_v22 = vpop.f32.mrb[19].mxu0 }
 0x101   :  { %v1509_v23 = vmul.f32 0.16666667, %v612_v10  ;;  %v582_v27 = vmin.f32 %v550_v11, 6.0  ;;  %v424_v28 = vmin.f32 %v392_v13, 6.0  ;;  %v362_v24 = vadd.f32 3.0, %v297_v14 }
 0x102   :  { %v613_v29 = vmul.f32 %v581_v18, %v485_v51  ;;  %v455_v32 = vmul.f32 %v423_v19, %v289_v49  ;;  %v393_v33 = vmax.f32 %v361_v20, 0.0  ;;  %v572_v31 = vmin.f32 %v540_v34, 6.0 }
 0x103   :  { %v614_v37 = vmul.f32 %v582_v27, %v486_v55  ;;  %v456_v39 = vmul.f32 %v424_v28, %v291_v56  ;;  %v394_v38 = vmax.f32 %v362_v24, 0.0  ;;  %v574_v41 = vmin.f32 %v542_v53, 6.0  ;;  %v1515_v42 = vpop.f32.mrb[20].mxu0  ;;  %v100_v55 = vpop.permute.xlu0 %99 }
 0x104   :  { %v1517_v43 = vmul.f32 0.16666667, %v613_v29  ;;  %v487_v47 = vmul.f32 0.16666667, %v455_v32  ;;  %v425_v45 = vmin.f32 %v393_v33, 6.0  ;;  %v604_v48 = vmul.f32 %v572_v31, %v1473_v12  ;;  %v1520_v50 = vpop.f32.mrb[21].mxu0 }
 0x105   :  { %v1522_v51 = vmul.f32 0.16666667, %v614_v37  ;;  %v488_v21 = vmul.f32 0.16666667, %v456_v39  ;;  %v426_v34 = vmin.f32 %v394_v38, 6.0  ;;  %v606_v49 = vmul.f32 %v574_v41, %v1484_v30 }
 0x106   :  { %v519_v52 = vadd.f32 3.0, %v487_v47  ;;  %v457_v54 = vmul.f32 %v425_v45, %v295_v9  ;;  %v636_v40 = vmul.f32 0.16666667, %v604_v48  ;;  %v571_v53 = vmin.f32 %v539_v25, 6.0 }
 0x107   :  { %v520_v56 = vadd.f32 3.0, %v488_v21  ;;  %v458_v60 = vmul.f32 %v426_v34, %v297_v14  ;;  %v638_v57 = vmul.f32 0.16666667, %v606_v49  ;;  %v573_v12 = vmin.f32 %v541_v44, 6.0  ;;  %v1529_v61 = vpop.f32.mrb[22].mxu0 }
 0x108   :  { %v551_v1 = vmax.f32 %v519_v52, 0.0  ;;  %v489_v62 = vmul.f32 0.16666667, %v457_v54  ;;  %v603_v0 = vmul.f32 %v571_v53, %v1471_v8  ;;  %v301_v30 = vadd.f32 %v300_v58, %v100_v55  ;;  %v1532_v3 = vpop.f32.mrb[23].mxu0  ;;  %v110_v52 = vpop.permute.xlu0 %109 }
 0x109   :  { %v552_v6 = vmax.f32 %v520_v56, 0.0  ;;  %v490_v7 = vmul.f32 0.16666667, %v458_v60  ;;  %v1164_v16 = vpack.c.bf16 %v638_v57, %v636_v40  ;;  %v605_v25 = vmul.f32 %v573_v12, %v1482_v26  ;;  %v115_v12 = vpop.permute.xlu1 %114 }
 0x10a   :  { %v583_v4 = vmin.f32 %v551_v1, 6.0  ;;  %v521_v9 = vadd.f32 3.0, %v489_v62  ;;  %v635_v10 = vmul.f32 0.16666667, %v603_v0  ;;  %v363_v11 = vadd.f32 3.0, %v301_v30 }
 0x10b   :  { %v584_v44 = vmin.f32 %v552_v6, 6.0  ;;  %v522_v13 = vadd.f32 3.0, %v490_v7  ;;  %1165 = vmatprep.subr.bf16.mxu1 %v1164_v16  ;;  %v637_v14 = vmul.f32 0.16666667, %v605_v25  ;;  %v303_v18 = vadd.f32 %v1501_v63, %v100_v55  ;;  %v1536_v8 = vpop.f32.mrb[24].mxu0 }
 0x10c   :  { %v615_v58 = vmul.f32 %v583_v4, %v487_v47  ;;  %v553_v19 = vmax.f32 %v521_v9, 0.0  ;;  %v395_v20 = vmax.f32 %v363_v11, 0.0  ;;  %v307_v27 = vadd.f32 %v306_v15, %v105_v35  ;;  %v1538_v28 = vpop.f32.mrb[25].mxu0 }
 0x10d   :  { %v616_v26 = vmul.f32 %v584_v44, %v488_v21  ;;  %v554_v24 = vmax.f32 %v522_v13, 0.0  ;;  %v1166_v29 = vpack.c.bf16 %v637_v14, %v635_v10  ;;  %v364_v32 = vadd.f32 3.0, %v303_v18 }
 0x10e   :  { %v1540_v33 = vmul.f32 0.16666667, %v615_v58  ;;  %v585_v31 = vmin.f32 %v553_v19, 6.0  ;;  %v427_v37 = vmin.f32 %v395_v20, 6.0  ;;  %v365_v39 = vadd.f32 3.0, %v307_v27 }
 0x10f   :  { %v1542_v38 = vmul.f32 0.16666667, %v616_v26  ;;  %v586_v63 = vmin.f32 %v554_v24, 6.0  ;;  %1167 = vmatpush1.bf16.msra.mxu1 %v1166_v29  ;;  %v396_v41 = vmax.f32 %v364_v32, 0.0  ;;  %v309_v47 = vadd.f32 %v1507_v22, %v105_v35  ;;  %v1545_v45 = vpop.f32.mrb[26].mxu0 }
 0x110   :  { %v617_v15 = vmul.f32 %v585_v31, %v489_v62  ;;  %v459_v48 = vmul.f32 %v427_v37, %v301_v30  ;;  %v397_v21 = vmax.f32 %v365_v39, 0.0  ;;  %v1168_v34 = vpack.c.bf16 %v1503_v2, %v1497_v46  ;;  %v1549_v49 = vpop.f32.mrb[27].mxu0 }
 0x111   :  { %v618_v54 = vmul.f32 %v586_v63, %v490_v7  ;;  %v428_v40 = vmin.f32 %v396_v41, 6.0  ;;  %v366_v53 = vadd.f32 3.0, %v309_v47  ;;  %v1170_v55 = vpack.c.bf16 %v1499_v59, %v1495_v36 }
 0x112   :  { %v1553_v56 = vmul.f32 0.16666667, %v617_v15  ;;  %v491_v22 = vmul.f32 0.16666667, %v459_v48  ;;  %v429_v60 = vmin.f32 %v397_v21, 6.0  ;;  %1169 = vmatprep.subr.bf16.mxu1 %v1168_v34  ;;  %v313_v57 = vadd.f32 %v1515_v42, %v110_v52 }
 0x113   :  { %v1556_v1 = vmul.f32 0.16666667, %v618_v54  ;;  %v460_v46 = vmul.f32 %v428_v40, %v303_v18  ;;  %v398_v2 = vmax.f32 %v366_v53, 0.0  ;;  %1171 = vmatpush1.bf16.msra.mxu1 %v1170_v55  ;;  %v315_v62 = vadd.f32 %v1520_v50, %v110_v52  ;;  %v1559_v0 = vpop.f32.mrb[28].mxu0 }
 0x114   :  { %v523_v30 = vadd.f32 3.0, %v491_v22  ;;  %v461_v6 = vmul.f32 %v429_v60, %v307_v27  ;;  %v367_v36 = vadd.f32 3.0, %v313_v57  ;;  %v319_v59 = vadd.f32 %v1529_v61, %v115_v12  ;;  %v1562_v7 = vpop.f32.mrb[29].mxu0 }
 0x115   :  { %v492_v16 = vmul.f32 0.16666667, %v460_v46  ;;  %v430_v25 = vmin.f32 %v398_v2, 6.0  ;;  %v368_v42 = vadd.f32 3.0, %v315_v62  ;;  %v321_v4 = vadd.f32 %v1532_v3, %v115_v12 }
 0x116   :  { %v555_v9 = vmax.f32 %v523_v30, 0.0  ;;  %v493_v10 = vmul.f32 0.16666667, %v461_v6  ;;  %v399_v11 = vmax.f32 %v367_v36, 0.0  ;;  %v369_v35 = vadd.f32 3.0, %v319_v59  ;;  %v120_v6 = vpop.permute.xlu0 %119 }
 0x117   :  { %v524_v44 = vadd.f32 3.0, %v492_v16  ;;  %v462_v50 = vmul.f32 %v430_v25, %v309_v47  ;;  %v400_v13 = vmax.f32 %v368_v42, 0.0  ;;  %v370_v14 = vadd.f32 3.0, %v321_v4  ;;  %v1565_v18 = vpop.f32.mrb[30].mxu0  ;;  %v125_v42 = vpop.permute.xlu1 %124 }
 0x118   :  { %v587_v58 = vmin.f32 %v555_v9, 6.0  ;;  %v525_v19 = vadd.f32 3.0, %v493_v10  ;;  %v431_v61 = vmin.f32 %v399_v11, 6.0  ;;  %v401_v20 = vmax.f32 %v369_v35, 0.0  ;;  %v1567_v27 = vpop.f32.mrb[31].mxu0 }
 0x119   :  { %v556_v26 = vmax.f32 %v524_v44, 0.0  ;;  %v494_v24 = vmul.f32 0.16666667, %v462_v50  ;;  %v432_v29 = vmin.f32 %v400_v13, 6.0  ;;  %v402_v3 = vmax.f32 %v370_v14, 0.0 }
 0x11a   :  { %v619_v32 = vmul.f32 %v587_v58, %v491_v22  ;;  %v557_v31 = vmax.f32 %v525_v19, 0.0  ;;  %v463_v37 = vmul.f32 %v431_v61, %v313_v57  ;;  %v433_v39 = vmin.f32 %v401_v20, 6.0 }
 0x11b   :  { %v588_v63 = vmin.f32 %v556_v26, 6.0  ;;  %v526_v41 = vadd.f32 3.0, %v494_v24  ;;  %v464_v47 = vmul.f32 %v432_v29, %v315_v62  ;;  %v434_v15 = vmin.f32 %v402_v3, 6.0 }
 0x11c   :  { %v1569_v48 = vmul.f32 0.16666667, %v619_v32  ;;  %v589_v21 = vmin.f32 %v557_v31, 6.0  ;;  %v495_v34 = vmul.f32 0.16666667, %v463_v37  ;;  %v465_v52 = vmul.f32 %v433_v39, %v319_v59 }
 0x11d   :  { %v620_v54 = vmul.f32 %v588_v63, %v492_v16  ;;  %v558_v40 = vmax.f32 %v526_v41, 0.0  ;;  %v496_v53 = vmul.f32 0.16666667, %v464_v47  ;;  %v466_v55 = vmul.f32 %v434_v15, %v321_v4 }
 0x11e   :  { %v621_v60 = vmul.f32 %v589_v21, %v493_v10  ;;  %v527_v12 = vadd.f32 3.0, %v495_v34  ;;  %v497_v46 = vmul.f32 0.16666667, %v465_v52  ;;  %v1172_v22 = vpack.c.bf16 %v1522_v51, %v1509_v23  ;;  %v130_v21 = vpop.permute.xlu0 %129 }
 0x11f   :  { %v1573_v57 = vmul.f32 0.16666667, %v620_v54  ;;  %v590_v2 = vmin.f32 %v558_v40, 6.0  ;;  %v528_v62 = vadd.f32 3.0, %v496_v53  ;;  %v498_v30 = vmul.f32 0.16666667, %v466_v55  ;;  %v135_v40 = vpop.permute.xlu1 %134 }
 0x120   :  { %v1575_v36 = vmul.f32 0.16666667, %v621_v60  ;;  %v559_v25 = vmax.f32 %v527_v12, 0.0  ;;  %v529_v59 = vadd.f32 3.0, %v497_v46  ;;  %1173 = vmatprep.subr.bf16.mxu1 %v1172_v22  ;;  %v1174_v16 = vpack.c.bf16 %v1517_v43, %v1505_v17 }
 0x121   :  { %v622_v4 = vmul.f32 %v590_v2, %v494_v24  ;;  %v560_v9 = vmax.f32 %v528_v62, 0.0  ;;  %v530_v10 = vadd.f32 3.0, %v498_v30  ;;  %v325_v23 = vadd.f32 %v1536_v8, %v120_v6 }
 0x122   :  { %v591_v51 = vmin.f32 %v559_v25, 6.0  ;;  %v561_v11 = vmax.f32 %v529_v59, 0.0  ;;  %1175 = vmatpush1.bf16.msra.mxu1 %v1174_v16  ;;  %v327_v35 = vadd.f32 %v1538_v28, %v120_v6  ;;  %v331_v44 = vadd.f32 %v1545_v45, %v125_v42 }
 0x123   :  { %v1582_v50 = vmul.f32 0.16666667, %v622_v4  ;;  %v592_v13 = vmin.f32 %v560_v9, 6.0  ;;  %v562_v14 = vmax.f32 %v530_v10, 0.0  ;;  %v371_v58 = vadd.f32 3.0, %v325_v23 }
 0x124   :  { %v623_v19 = vmul.f32 %v591_v51, %v495_v34  ;;  %v593_v17 = vmin.f32 %v561_v11, 6.0  ;;  %v372_v43 = vadd.f32 3.0, %v327_v35  ;;  %v373_v61 = vadd.f32 3.0, %v331_v44 }
 0x125   :  { %v624_v20 = vmul.f32 %v592_v13, %v496_v53  ;;  %v594_v26 = vmin.f32 %v562_v14, 6.0  ;;  %v403_v24 = vmax.f32 %v371_v58, 0.0  ;;  %v333_v8 = vadd.f32 %v1549_v49, %v125_v42 }
 0x126   :  { %v1585_v29 = vmul.f32 0.16666667, %v623_v19  ;;  %v625_v3 = vmul.f32 %v593_v17, %v497_v46  ;;  %v404_v28 = vmax.f32 %v372_v43, 0.0  ;;  %v405_v32 = vmax.f32 %v373_v61, 0.0 }
 0x127   :  { %v1587_v45 = vmul.f32 0.16666667, %v624_v20  ;;  %v626_v31 = vmul.f32 %v594_v26, %v498_v30  ;;  %v435_v37 = vmin.f32 %v403_v24, 6.0  ;;  %v374_v39 = vadd.f32 3.0, %v333_v8 }
 0x128   :  { %v1589_v63 = vmul.f32 0.16666667, %v625_v3  ;;  %v436_v41 = vmin.f32 %v404_v28, 6.0  ;;  %v437_v47 = vmin.f32 %v405_v32, 6.0  ;;  %v1176_v15 = vpack.c.bf16 %v1556_v1, %v1542_v38 }
 0x129   :  { %v1593_v34 = vmul.f32 0.16666667, %v626_v31  ;;  %v467_v49 = vmul.f32 %v435_v37, %v325_v23  ;;  %v406_v52 = vmax.f32 %v374_v39, 0.0  ;;  %v1178_v54 = vpack.c.bf16 %v1553_v56, %v1540_v33 }
 0x12a   :  { %v468_v53 = vmul.f32 %v436_v41, %v327_v35  ;;  %v469_v55 = vmul.f32 %v437_v47, %v331_v44  ;;  %1177 = vmatprep.subr.bf16.mxu1 %v1176_v15  ;;  %v337_v60 = vadd.f32 %v1559_v0, %v130_v21  ;;  %v339_v12 = vadd.f32 %v1562_v7, %v130_v21 }
 0x12b   :  { %v499_v46 = vmul.f32 0.16666667, %v467_v49  ;;  %v438_v22 = vmin.f32 %v406_v52, 6.0  ;;  %1179 = vmatpush1.bf16.msra.mxu1 %v1178_v54  ;;  %v343_v38 = vadd.f32 %v1565_v18, %v135_v40  ;;  %v345_v1 = vadd.f32 %v1567_v27, %v135_v40 }
 0x12c   :  { %v500_v2 = vmul.f32 0.16666667, %v468_v53  ;;  %v501_v62 = vmul.f32 0.16666667, %v469_v55  ;;  %v375_v30 = vadd.f32 3.0, %v337_v60  ;;  %v376_v6 = vadd.f32 3.0, %v339_v12 }
 0x12d   :  { %v531_v33 = vadd.f32 3.0, %v499_v46  ;;  %v470_v56 = vmul.f32 %v438_v22, %v333_v8  ;;  %v377_v25 = vadd.f32 3.0, %v343_v38  ;;  %v378_v59 = vadd.f32 3.0, %v345_v1 }
 0x12e   :  { %v532_v16 = vadd.f32 3.0, %v500_v2  ;;  %v533_v42 = vadd.f32 3.0, %v501_v62  ;;  %v407_v0 = vmax.f32 %v375_v30, 0.0  ;;  %v408_v4 = vmax.f32 %v376_v6, 0.0 }
 0x12f   :  { %v563_v7 = vmax.f32 %v531_v33, 0.0  ;;  %v502_v9 = vmul.f32 0.16666667, %v470_v56  ;;  %v409_v10 = vmax.f32 %v377_v25, 0.0  ;;  %v410_v23 = vmax.f32 %v378_v59, 0.0 }
 0x130   :  { %v564_v51 = vmax.f32 %v532_v16, 0.0  ;;  %v565_v18 = vmax.f32 %v533_v42, 0.0  ;;  %v439_v11 = vmin.f32 %v407_v0, 6.0  ;;  %v440_v27 = vmin.f32 %v408_v4, 6.0  ;;  %v667_v42 = vld [vmem:[%s1788_s3] sm:$0xff]  ;;  %v668_v0 = vld [vmem:[%s1788_s3 + $0x8] sm:$0xff] }
 0x131   :  { %v595_v35 = vmin.f32 %v563_v7, 6.0  ;;  %v534_v44 = vadd.f32 3.0, %v502_v9  ;;  %v441_v13 = vmin.f32 %v409_v10, 6.0  ;;  %v442_v14 = vmin.f32 %v410_v23, 6.0  ;;  %v669_v4 = vld [vmem:[%s1788_s3 + $0x10] sm:$0xff]  ;;  %v670_v7 = vld [vmem:[%s1788_s3 + $0x18] sm:$0xff]  ;;  %v693_v10 = vpop.permute.xlu1 %692 }
 0x132   :  { %v596_v58 = vmin.f32 %v564_v51, 6.0  ;;  %v597_v19 = vmin.f32 %v565_v18, 6.0  ;;  %v471_v17 = vmul.f32 %v439_v11, %v337_v60  ;;  %v472_v43 = vmul.f32 %v440_v27, %v339_v12  ;;  %s1287_s3 = smov [#allocation2]  }
 0x133   :  { %v627_v61 = vmul.f32 %v595_v35, %v499_v46  ;;  %v566_v20 = vmax.f32 %v534_v44, 0.0  ;;  %v473_v26 = vmul.f32 %v441_v13, %v343_v38  ;;  %v474_v24 = vmul.f32 %v442_v14, %v345_v1  ;;  %s1128_s25 = sshll.u32 %s1287_s3, 4  ;;  %s1129_s25 = int_to_ptr.vmem [resolvable:$true] %s1128_s25 }
 0x134   :  { %v628_v8 = vmul.f32 %v596_v58, %v500_v2  ;;  %v629_v3 = vmul.f32 %v597_v19, %v501_v62  ;;  %v503_v28 = vmul.f32 0.16666667, %v471_v17  ;;  %v504_v32 = vmul.f32 0.16666667, %v472_v43  ;;  %s1255_s26 = scalar_lea.vmem %s1129_s25, 16  ;;  %s1259_s27 = scalar_lea.vmem %s1129_s25, 32 }
 0x135   :  { %v659_v31 = vmul.f32 0.16666667, %v627_v61  ;;  %v598_v37 = vmin.f32 %v566_v20, 6.0  ;;  %v505_v39 = vmul.f32 0.16666667, %v473_v26  ;;  %v1180_v41 = vpack.c.bf16 %v1582_v50, %v1573_v57  ;;  %v683_v44 = vpop.permute.xlu1 %682  ;;  %p1256_p0 = scmp.ne.s32.totalorder %s1129_s25, %s1255_s26  ;;  %p1260_p1 = scmp.lt.s32.totalorder %s1129_s25, %s1129_s25 }
 0x136   :  { %v660_v47 = vmul.f32 0.16666667, %v628_v8  ;;  %v661_v15 = vmul.f32 0.16666667, %v629_v3  ;;  %v535_v21 = vadd.f32 3.0, %v503_v28  ;;  %v536_v49 = vadd.f32 3.0, %v504_v32  ;;  %p1261_p2 = scmp.lt.s32.totalorder %s1259_s27, %s1255_s26 }
 0x137   :  { %v630_v52 = vmul.f32 %v598_v37, %v502_v9  ;;  %v537_v54 = vadd.f32 3.0, %v505_v39  ;;  %v506_v40 = vmul.f32 0.16666667, %v474_v24  ;;  %1181 = vmatprep.subr.bf16.mxu1 %v1180_v41  ;;  %v1182_v53 = vpack.c.bf16 %v1575_v36, %v1569_v48  ;;  %v688_v9 = vpop.permute.xlu0 %687 }
 0x138   :  { %v567_v55 = vmax.f32 %v535_v21, 0.0  ;;  %v568_v60 = vmax.f32 %v536_v49, 0.0  ;;  %v1184_v12 = vpack.c.bf16 %v1593_v34, %v1587_v45  ;;  %v1186_v46 = vpack.c.bf16 %v1589_v63, %v1585_v29  ;;  %p1262_p3 = por %p1261_p2, %p1260_p1 }
 0x139   :  { %v662_v57 = vmul.f32 0.16666667, %v630_v52  ;;  %v569_v50 = vmax.f32 %v537_v54, 0.0  ;;  %v538_v22 = vadd.f32 3.0, %v506_v40  ;;  %1183 = vmatpush1.bf16.msra.mxu1 %v1182_v53  ;;  %v1190_v38 = vpack.c.bf16 %v661_v15, %v659_v31 }
 0x13a   :  { %v599_v1 = vmin.f32 %v567_v55, 6.0  ;;  %v600_v2 = vmin.f32 %v568_v60, 6.0  ;;  %1185 = vmatprep.subr.bf16.mxu1 %v1184_v12  ;;  %p1263_p4 = pnand %p1262_p3, %p1256_p0 }
 0x13b   :  { %v601_v62 = vmin.f32 %v569_v50, 6.0  ;;  %v570_v30 = vmax.f32 %v538_v22, 0.0  ;;  %v1188_v6 = vpack.c.bf16 %v662_v57, %v660_v47  ;;  %v678_v23 = vpop.permute.xlu0 %677 }
 0x13c   :  { %v631_v48 = vmul.f32 %v599_v1, %v503_v28  ;;  %v632_v36 = vmul.f32 %v600_v2, %v504_v32 }
 0x13d   :  { %v633_v33 = vmul.f32 %v601_v62, %v505_v39  ;;  %v602_v56 = vmin.f32 %v570_v30, 6.0  ;;  %1187 = vmatpush1.bf16.msra.mxu1 %v1186_v46 }
 0x13e   :  { %1189 = vmatprep.subr.bf16.mxu1 %v1188_v6  ;;  %v663_v45 = vmul.f32 0.16666667, %v631_v48  ;;  %v664_v63 = vmul.f32 0.16666667, %v632_v36 }
 0x13f   :  { %v665_v34 = vmul.f32 0.16666667, %v633_v33  ;;  %v634_v29 = vmul.f32 %v602_v56, %v506_v40 }
 0x141   :  { %v666_v25 = vmul.f32 0.16666667, %v634_v29  ;;  %1191 = vmatpush1.bf16.msra.mxu1 %v1190_v38  ;;  %v1194_v59 = vpack.c.bf16 %v665_v34, %v663_v45 }
 0x143   :  { %v1192_v16 = vpack.c.bf16 %v666_v25, %v664_v63 }
 0x145   :  { %1193 = vmatprep.subr.bf16.mxu1 %v1192_v16 }
 0x146   :  { %1195 = vmatpush1.bf16.msra.mxu1 %v1194_v59 }
 0x149   :  { %760 = vmatmul.mubr.f32.vlgmr.msra.gmra.mrb[0].mxu1 %v667_v42 }
 0x14a   :  { %765 = vmatprep.mubr.f32.mxu1 %v1279_v5 }
 0x14d   :  { %766 = vmatmul.mubr.f32.gmra.mrb[2].mxu1 %v668_v0 }
 0x14e   :  { %771 = vmatprep.mubr.f32.mxu1 %v1279_v5 }
 0x151   :  { %772 = vmatmul.mubr.f32.gmra.mrb[4].mxu1 %v669_v4 }
 0x152   :  { %777 = vmatprep.mubr.f32.mxu1 %v1279_v5 }
 0x155   :  { %778 = vmatmul.mubr.f32.gmra.mrb[6].mxu1 %v670_v7 }
 0x21c   :  { %v761_v51 = vpop.f32.mrb[0].mxu1 }
 0x21d   :  { %v1624_v18 = vadd.f32 %v761_v51, %v678_v23  ;;  %v763_v11 = vpop.f32.mrb[1].mxu1 }
 0x21e   :  { %v1626_v27 = vadd.f32 %v763_v11, %v678_v23 }
 0x21f   :  { %v792_v35 = vmin.f32 %v1624_v18, 20.0  ;;  %vm784_vm1 = vcmp.gt.f32.partialorder %v1624_v18, 20.0 }
 0x220   :  { %v793_v13 = vmin.f32 %v1626_v27, 20.0  ;;  %v767_v5 = vpop.f32.mrb[2].mxu1  ;;  %vm785_vm2 = vcmp.gt.f32.partialorder %v1626_v27, 20.0 }
 0x221   :  { %v800_v14 = vmul.f32 1.442695, %v792_v35  ;;  %v1630_v58 = vadd.f32 %v767_v5, %v683_v44  ;;  %v769_v19 = vpop.f32.mrb[3].mxu1 }
 0x222   :  { %v802_v17 = vmul.f32 1.442695, %v793_v13  ;;  %v1632_v43 = vadd.f32 %v769_v19, %v683_v44 }
 0x223   :  { %1215 = vpow2.f32 %v800_v14  ;;  %v794_v61 = vmin.f32 %v1630_v58, 20.0  ;;  %vm786_vm4 = vcmp.gt.f32.partialorder %v1630_v58, 20.0 }
 0x224   :  { %1217 = vpow2.f32 %v802_v17  ;;  %v795_v20 = vmin.f32 %v1632_v43, 20.0  ;;  %v773_v26 = vpop.f32.mrb[4].mxu1  ;;  %vm787_vm8 = vcmp.gt.f32.partialorder %v1632_v43, 20.0 }
 0x225   :  { %v804_v24 = vmul.f32 1.442695, %v794_v61  ;;  %v1636_v8 = vadd.f32 %v773_v26, %v688_v9  ;;  %v775_v3 = vpop.f32.mrb[5].mxu1  ;;  %v1282_v61 = vmov 2475754826  }
 0x226   :  { %v806_v28 = vmul.f32 1.442695, %v795_v20  ;;  %v1638_v32 = vadd.f32 %v775_v3, %v688_v9 }
 0x227   :  { %1219 = vpow2.f32 %v804_v24  ;;  %v796_v31 = vmin.f32 %v1636_v8, 20.0  ;;  %vm788_vm10 = vcmp.gt.f32.partialorder %v1636_v8, 20.0 }
 0x228   :  { %1221 = vpow2.f32 %v806_v28  ;;  %v797_v37 = vmin.f32 %v1638_v32, 20.0  ;;  %v779_v39 = vpop.f32.mrb[6].mxu1  ;;  %vm789_vm12 = vcmp.gt.f32.partialorder %v1638_v32, 20.0 }
 0x229   :  { %v808_v41 = vmul.f32 1.442695, %v796_v31  ;;  %v1642_v47 = vadd.f32 %v779_v39, %v693_v10  ;;  %v781_v15 = vpop.f32.mrb[7].mxu1 }
 0x22a   :  { %v810_v21 = vmul.f32 1.442695, %v797_v37  ;;  %v1645_v60 = vadd.f32 %v781_v15, %v693_v10 }
 0x22b   :  { %1223 = vpow2.f32 %v808_v41  ;;  %v798_v49 = vmin.f32 %v1642_v47, 20.0  ;;  %vm790_vm15 = vcmp.gt.f32.partialorder %v1642_v47, 20.0 }
 0x22c   :  { %1225 = vpow2.f32 %v810_v21  ;;  %v799_v38 = vmin.f32 %v1645_v60, 20.0  ;;  %vm791_vm0 = vcmp.gt.f32.partialorder %v1645_v60, 20.0 }
 0x22d   :  { %v1216_v52 = vpop.eup %1215  ;;  %v812_v54 = vmul.f32 1.442695, %v798_v49 }
 0x22e   :  { %v1218_v40 = vpop.eup %1217  ;;  %v816_v53 = vadd.f32 1.0, %v1216_v52  ;;  %v819_v50 = vmul.f32 -0.5, %v1216_v52  ;;  %v822_v30 = vand.u32 2147483647, %v1216_v52  ;;  %v814_v56 = vmul.f32 1.442695, %v799_v38 }
 0x22f   :  { %v825_v55 = vadd.f32 1.0, %v1218_v40  ;;  %1227 = vpow2.f32 %v812_v54  ;;  %v828_v1 = vmul.f32 -0.5, %v1218_v40  ;;  %v831_v63 = vand.u32 2147483647, %v1218_v40 }
 0x230   :  { %1229 = vlog2.f32 %v816_v53  ;;  %v820_v36 = vadd.f32 1.0, %v819_v50  ;;  %vm1655_vm3 = vcmp.lt.f32.partialorder %v822_v30, 0.0004427343 }
 0x231   :  { %v1220_v12 = vpop.eup %1219  ;;  %1231 = vlog2.f32 %v825_v55  ;;  %v829_v45 = vadd.f32 1.0, %v828_v1  ;;  %vm832_vm5 = vcmp.lt.f32.partialorder %v831_v63, 0.0004427343 }
 0x232   :  { %v1222_v46 = vpop.eup %1221  ;;  %v834_v57 = vadd.f32 1.0, %v1220_v12  ;;  %v837_v6 = vmul.f32 -0.5, %v1220_v12  ;;  %v840_v42 = vand.u32 2147483647, %v1220_v12  ;;  %v821_v7 = vmul.f32 %v1216_v52, %v820_v36 }
 0x233   :  { %v843_v22 = vadd.f32 1.0, %v1222_v46  ;;  %v846_v34 = vmul.f32 -0.5, %v1222_v46  ;;  %v830_v23 = vmul.f32 %v1218_v40, %v829_v45  ;;  %v849_v44 = vand.u32 2147483647, %v1222_v46 }
 0x234   :  { %1233 = vlog2.f32 %v834_v57  ;;  %v838_v16 = vadd.f32 1.0, %v837_v6  ;;  %vm1667_vm6 = vcmp.lt.f32.partialorder %v840_v42, 0.0004427343 }
 0x235   :  { %v1224_v2 = vpop.eup %1223  ;;  %1235 = vlog2.f32 %v843_v22  ;;  %v847_v51 = vadd.f32 1.0, %v846_v34  ;;  %vm850_vm7 = vcmp.lt.f32.partialorder %v849_v44, 0.0004427343 }
 0x236   :  { %v1648_v62 = vpop.eup %1225  ;;  %v852_v48 = vadd.f32 1.0, %v1224_v2  ;;  %v855_v9 = vmul.f32 -0.5, %v1224_v2  ;;  %v839_v17 = vmul.f32 %v1220_v12, %v838_v16  ;;  %v858_v28 = vand.u32 2147483647, %v1224_v2 }
 0x237   :  { %v861_v33 = vadd.f32 1.0, %v1648_v62  ;;  %v864_v11 = vmul.f32 -0.5, %v1648_v62  ;;  %v848_v39 = vmul.f32 %v1222_v46, %v847_v51  ;;  %v867_v15 = vand.u32 2147483647, %v1648_v62 }
 0x238   :  { %1237 = vlog2.f32 %v852_v48  ;;  %v856_v3 = vadd.f32 1.0, %v855_v9  ;;  %vm859_vm9 = vcmp.lt.f32.partialorder %v858_v28, 0.0004427343  ;;  %v1284_v28 = vmov 2102212464  }
 0x239   :  { %v1651_v29 = vpop.eup %1227  ;;  %1239 = vlog2.f32 %v861_v33  ;;  %v865_v41 = vadd.f32 1.0, %v864_v11  ;;  %vm868_vm11 = vcmp.lt.f32.partialorder %v867_v15, 0.0004427343  ;;  %v1286_v15 = vmov 1326507024  }
 0x23a   :  { %v1230_v25 = vpop.eup %1229  ;;  %1241 = vpow2.f32 %v814_v56  ;;  %v870_v13 = vadd.f32 1.0, %v1651_v29  ;;  %v857_v53 = vmul.f32 %v1224_v2, %v856_v3  ;;  %v873_v30 = vmul.f32 -0.5, %v1651_v29 }
 0x23b   :  { %v1232_v0 = vpop.eup %1231  ;;  %v818_v4 = vmul.f32 0.6931472, %v1230_v25  ;;  %v866_v46 = vmul.f32 %v1648_v62, %v865_v41 }
 0x23c   :  { %v827_v10 = vmul.f32 0.6931472, %v1232_v0  ;;  %1243 = vlog2.f32 %v870_v13  ;;  %v874_v33 = vadd.f32 1.0, %v873_v30 }
 0x23d   :  { %v824_v35 = vsel %vm1655_vm3, %v821_v7, %v818_v4 }
 0x23e   :  { %v1234_v5 = vpop.eup %1233  ;;  %v888_v14 = vsel %vm784_vm1, %v1624_v18, %v824_v35  ;;  %v833_v19 = vsel %vm832_vm5, %v830_v23, %v827_v10  ;;  %v875_v25 = vmul.f32 %v1651_v29, %v874_v33 }
 0x23f   :  { %v1236_v20 = vpop.eup %1235  ;;  %v889_v26 = vsel %vm785_vm2, %v1626_v27, %v833_v19  ;;  %v836_v24 = vmul.f32 0.6931472, %v1234_v5  ;;  %v1281_v19 = vmov 683565275  }
 0x240   :  { %v1674_v31 = vmul.f32 %v889_v26, %v888_v14  ;;  %v845_v37 = vmul.f32 0.6931472, %v1236_v20 }
 0x241   :  { %v842_v18 = vsel %vm1667_vm6, %v839_v17, %v836_v24  ;;  %v1283_v24 = vmov 2131351028  }
 0x242   :  { %v1238_v21 = vpop.eup %1237  ;;  %v890_v27 = vsel %vm786_vm4, %v1630_v58, %v842_v18  ;;  %v851_v49 = vsel %vm850_vm7, %v848_v39, %v845_v37  ;;  %v1285_v39 = vmov 920167782  }
 0x243   :  { %v1240_v52 = vpop.eup %1239  ;;  %v891_v54 = vsel %vm787_vm8, %v1632_v43, %v851_v49  ;;  %v854_v40 = vmul.f32 0.6931472, %v1238_v21 }
 0x244   :  { %v1684_v55 = vmul.f32 %v891_v54, %v890_v27  ;;  %v863_v12 = vmul.f32 0.6931472, %v1240_v52  ;;  %v1242_v57 = vpop.eup %1241 }
 0x245   :  { %v860_v50 = vsel %vm859_vm9, %v857_v53, %v854_v40  ;;  %v879_v38 = vadd.f32 1.0, %v1242_v57  ;;  %v882_v48 = vmul.f32 -0.5, %v1242_v57 }
 0x246   :  { %v892_v58 = vsel %vm788_vm10, %v1636_v8, %v860_v50  ;;  %v869_v22 = vsel %vm868_vm11, %v866_v46, %v863_v12  ;;  %v1244_v62 = vpop.eup %1243  ;;  %v876_v8 = vand.u32 2147483647, %v1651_v29 }
 0x247   :  { %v896_v43 = vmul.f32 6.2831855, %v892_v58  ;;  %v893_v1 = vsel %vm789_vm12, %v1638_v32, %v869_v22  ;;  %1245 = vlog2.f32 %v879_v38  ;;  %v872_v45 = vmul.f32 0.6931472, %v1244_v62 }
 0x248   :  { %v897_v2 = vmul.f32 6.2831855, %v893_v1  ;;  %v883_v34 = vadd.f32 1.0, %v882_v48  ;;  %v885_v32 = vand.u32 2147483647, %v1242_v57 }
 0x249   :  { %vm877_vm13 = vcmp.lt.f32.partialorder %v876_v8, 0.0004427343 }
 0x24a   :  { %v1692_v6 = vsub.f32 %v896_v43, %v897_v2  ;;  %v878_v0 = vsel %vm877_vm13, %v875_v25, %v872_v45  ;;  %v884_v7 = vmul.f32 %v1242_v57, %v883_v34  ;;  %vm886_vm1 = vcmp.lt.f32.partialorder %v885_v32, 0.0004427343 }
 0x24b   :  { %v894_v29 = vsel %vm790_vm15, %v1642_v47, %v878_v0 }
 0x24c   :  { %v907_v36 = vand.u32 2139095040, %v1692_v6  ;;  %v904_v59 = vand.u32 2147483647, %v1692_v6  ;;  %v898_v44 = vmul.f32 6.2831855, %v894_v29 }
 0x24e   :  { %v908_v56 = vshrl.u32 %v907_v36, 23  ;;  %v911_v9 = vand.u32 8388607, %v904_v59  ;;  %vm905_vm15 = vcmp.le.f32.partialorder %v904_v59, 0.7853982 }
 0x250   :  { %v1152_v63 = vadd.s32 4294967169, %v908_v56  ;;  %v912_v5 = vor.u32 8388608, %v911_v9 }
 0x251   :  { %v1246_v16 = vpop.eup %1245 }
 0x252   :  { %v914_v42 = vadd.s32 1, %v1152_v63  ;;  %v881_v4 = vmul.f32 0.6931472, %v1246_v16  ;;  %v952_v1 = vshll.u32 %v912_v5, 8 }
 0x254   :  { %vm915_vm14 = vcmp.gt.s32.totalorder %v914_v42, 0  ;;  %v887_v23 = vsel %vm886_vm1, %v884_v7, %v881_v4 }
 0x255   :  { %v916_v10 = vsel %vm915_vm14, %v914_v42, 0  ;;  %v895_v11 = vsel %vm791_vm0, %v1645_v60, %v887_v23  ;;  %vm906_vm14 = vcmp.lt.s32.totalorder %v1692_v6, 0 }
 0x256   :  { %v918_v51 = vand.u32 31, %v916_v10  ;;  %v899_v13 = vmul.f32 6.2831855, %v895_v11  ;;  %v917_v14 = vshrl.u32 %v916_v10, 5 }
 0x258   :  { %v919_v35 = vsub.s32 32, %v918_v51  ;;  %v921_v17 = vshll.u32 %v1281_v19, %v918_v51  ;;  %v924_v20 = vshll.u32 %v1282_v61, %v918_v51  ;;  %v927_v3 = vshll.u32 %v1283_v24, %v918_v51 }
 0x259   :  { %v930_v37 = vshll.u32 %v1284_v28, %v918_v51  ;;  %v933_v18 = vshll.u32 %v1285_v39, %v918_v51  ;;  %v1713_v54 = vsub.f32 %v898_v44, %v899_v13  ;;  %vm936_vm2 = vcmp.lt.s32.totalorder %v917_v14, 1 }
 0x25a   :  { %v922_v26 = vshrl.u32 %v1282_v61, %v919_v35  ;;  %v925_v47 = vshrl.u32 %v1283_v24, %v919_v35  ;;  %v928_v60 = vshrl.u32 %v1284_v28, %v919_v35  ;;  %v931_v41 = vshrl.u32 %v1285_v39, %v919_v35 }
 0x25b   :  { %v934_v21 = vshrl.u32 %v1286_v15, %v919_v35  ;;  %vm939_vm3 = vcmp.lt.s32.totalorder %v917_v14, 4  ;;  %v920_v50 = vshrl.u32 %v1281_v19, %v919_v35  ;;  %vm938_vm4 = vcmp.lt.s32.totalorder %v917_v14, 3 }
 0x25c   :  { %v923_v27 = vor.u32 %v922_v26, %v921_v17  ;;  %v926_v49 = vor.u32 %v925_v47, %v924_v20  ;;  %v929_v52 = vor.u32 %v928_v60, %v927_v3  ;;  %v932_v40 = vor.u32 %v931_v41, %v930_v37 }
 0x25d   :  { %v935_v53 = vor.u32 %v934_v21, %v933_v18  ;;  %vm937_vm5 = vcmp.lt.s32.totalorder %v917_v14, 2  ;;  %v1011_v45 = vand.u32 2139095040, %v1713_v54  ;;  %v1008_v63 = vand.u32 2147483647, %v1713_v54 }
 0x25e   :  { %v941_v12 = vsel %vm939_vm3, %v929_v52, 2102212464  ;;  %v944_v46 = vsel %vm936_vm2, %v923_v27, %v926_v49  ;;  %v948_v57 = vsel %vm936_vm2, %v926_v49, %v929_v52  ;;  %v945_v58 = vsel %vm939_vm3, %v932_v40, 920167782 }
 0x25f   :  { %v949_v22 = vsel %vm939_vm3, %v935_v53, 1326507024  ;;  %v946_v38 = vsel %vm938_vm4, %v929_v52, %v945_v58  ;;  %v940_v2 = vsel %vm936_vm2, %v920_v50, %v923_v27  ;;  %v942_v30 = vsel %vm938_vm4, %v926_v49, %v941_v12 }
 0x260   :  { %v950_v43 = vsel %vm938_vm4, %v932_v40, %v949_v22  ;;  %v947_v62 = vsel %vm937_vm5, %v944_v46, %v946_v38  ;;  %v943_v34 = vsel %vm937_vm5, %v940_v2, %v942_v30  ;;  %v1012_v25 = vshrl.u32 %v1011_v45, 23 }
 0x261   :  { %v951_v48 = vsel %vm937_vm5, %v948_v57, %v950_v43  ;;  %v1719_v8 = vmul.u32.u64.low %v952_v1, %v947_v62  ;;  %v1720_v56 = vmul.u32.u64.high %v952_v1, %v947_v62, %v1719_v8  ;;  %v959_v16 = vmul.u32 %v952_v1, %v943_v34 }
 0x262   :  { %v1716_v36 = vmul.u32.u64.low %v952_v1, %v951_v48  ;;  %v1717_v33 = vmul.u32.u64.high %v952_v1, %v951_v48, %v1716_v36  ;;  %v1156_v42 = vadd.s32 4294967169, %v1012_v25  ;;  %v1015_v4 = vand.u32 8388607, %v1008_v63 }
 0x263   :  { %v962_v32 = vadd.s32 1, %v1720_v56  ;;  %vm996_vm4 = vweird.f32 %v1692_v6  ;;  %vm1010_vm5 = vcmp.lt.s32.totalorder %v1713_v54, 0 }
 0x264   :  { %vm961_vm6 = vc.u32 %v1717_v33, %v1719_v8  ;;  %v1018_v9 = vadd.s32 1, %v1156_v42  ;;  %v1016_v29 = vor.u32 8388608, %v1015_v4  ;;  %v960_v34 = vadd.s32 %v1719_v8, %v1717_v33 }
 0x265   :  { %v963_v0 = vsel %vm961_vm6, %v962_v32, %v1720_v56  ;;  %vm1009_vm6 = vcmp.le.f32.partialorder %v1008_v63, 0.7853982 }
 0x266   :  { %v964_v7 = vadd.s32 %v963_v0, %v959_v16  ;;  %vm1019_vm7 = vcmp.gt.s32.totalorder %v1018_v9, 0  ;;  %v1056_v20 = vshll.u32 %v1016_v29, 8 }
 0x267   :  { %v1020_v23 = vsel %vm1019_vm7, %v1018_v9, 0 }
 0x268   :  { %v965_v10 = vadd.s32 536870912, %v964_v7  ;;  %v1022_v11 = vand.u32 31, %v1020_v23  ;;  %v1021_v44 = vshrl.u32 %v1020_v23, 5 }
 0x26a   :  { %v1731_v51 = vshrl.u32 %v965_v10, 30  ;;  %v1023_v13 = vsub.s32 32, %v1022_v11  ;;  %v1025_v5 = vshll.u32 %v1281_v19, %v1022_v11  ;;  %v1028_v14 = vshll.u32 %v1282_v61, %v1022_v11 }
 0x26b   :  { %v1031_v17 = vshll.u32 %v1283_v24, %v1022_v11  ;;  %v1034_v60 = vshll.u32 %v1284_v28, %v1022_v11  ;;  %v1037_v18 = vshll.u32 %v1285_v39, %v1022_v11  ;;  %vm1040_vm8 = vcmp.lt.s32.totalorder %v1021_v44, 1 }
 0x26c   :  { %v967_v35 = vshll.u32 %v1731_v51, 30  ;;  %v1026_v47 = vshrl.u32 %v1282_v61, %v1023_v13  ;;  %v1029_v3 = vshrl.u32 %v1283_v24, %v1023_v13  ;;  %v1032_v37 = vshrl.u32 %v1284_v28, %v1023_v13 }
 0x26d   :  { %v1035_v41 = vshrl.u32 %v1285_v39, %v1023_v13  ;;  %v1038_v21 = vshrl.u32 %v1286_v15, %v1023_v13  ;;  %v1024_v40 = vshrl.u32 %v1281_v19, %v1023_v13  ;;  %vm1042_vm9 = vcmp.lt.s32.totalorder %v1021_v44, 3 }
 0x26e   :  { %v968_v26 = vsub.s32 %v964_v7, %v967_v35  ;;  %v1027_v49 = vor.u32 %v1026_v47, %v1025_v5  ;;  %v1030_v52 = vor.u32 %v1029_v3, %v1028_v14  ;;  %v1033_v53 = vor.u32 %v1032_v37, %v1031_v17 }
 0x26f   :  { %v1036_v12 = vor.u32 %v1035_v41, %v1034_v60  ;;  %v1039_v61 = vor.u32 %v1038_v21, %v1037_v18  ;;  %vm1043_vm10 = vcmp.lt.s32.totalorder %v1021_v44, 4  ;;  %vm1041_vm11 = vcmp.lt.s32.totalorder %v1021_v44, 2 }
 0x270   :  { %v970_v27 = vsub.s32 0, %v968_v26  ;;  %v1048_v24 = vsel %vm1040_vm8, %v1027_v49, %v1030_v52  ;;  %v1045_v28 = vsel %vm1043_vm10, %v1033_v53, 2102212464  ;;  %v1052_v50 = vsel %vm1040_vm8, %v1030_v52, %v1033_v53 }
 0x271   :  { %v1049_v57 = vsel %vm1043_vm10, %v1036_v12, 920167782  ;;  %v1053_v39 = vsel %vm1043_vm10, %v1039_v61, 1326507024  ;;  %v1044_v38 = vsel %vm1040_vm8, %v1024_v40, %v1027_v49  ;;  %v1046_v2 = vsel %vm1042_vm9, %v1030_v52, %v1045_v28 }
 0x272   :  { %v1153_v46 = vmin.u32 %v970_v27, %v968_v26  ;;  %v1050_v58 = vsel %vm1042_vm9, %v1033_v53, %v1049_v57  ;;  %v1054_v22 = vsel %vm1042_vm9, %v1036_v12, %v1053_v39  ;;  %v1047_v45 = vsel %vm1041_vm11, %v1044_v38, %v1046_v2 }
 0x273   :  { %v1051_v19 = vsel %vm1041_vm11, %v1048_v24, %v1050_v58  ;;  %v1055_v43 = vsel %vm1041_vm11, %v1052_v50, %v1054_v22  ;;  %v1063_v7 = vmul.u32 %v1056_v20, %v1047_v45  ;;  %v990_v14 = vsub.s32 4, %v1731_v51 }
 0x274   :  { %v972_v15 = vclz %v1153_v46  ;;  %v1747_v30 = vmul.u32.u64.low %v1056_v20, %v1055_v43  ;;  %v1748_v62 = vmul.u32.u64.high %v1056_v20, %v1055_v43, %v1747_v30  ;;  %vm1100_vm10 = vweird.f32 %v1713_v54 }
 0x275   :  { %v1750_v48 = vmul.u32.u64.low %v1056_v20, %v1051_v19  ;;  %v1751_v36 = vmul.u32.u64.high %v1056_v20, %v1051_v19, %v1750_v48  ;;  %v991_v3 = vsel %vm906_vm14, %v990_v14, %v1731_v51 }
 0x276   :  { %v1154_v1 = vadd.s32 4294967294, %v972_v15  ;;  %v993_v41 = vsel %vm905_vm15, 0, %v991_v3 }
 0x277   :  { %vm1065_vm13 = vc.u32 %v1748_v62, %v1750_v48  ;;  %v1066_v16 = vadd.s32 1, %v1751_v36  ;;  %v997_v27 = vadd.s32 3, %v993_v41  ;;  %v1064_v52 = vadd.s32 %v1750_v48, %v1748_v62 }
 0x278   :  { %vm1155_vm12 = vcmp.lt.s32.totalorder %v1154_v1, 0 }
 0x279   :  { %v975_v56 = vsel %vm1155_vm12, 0, %v1154_v1  ;;  %v1067_v9 = vsel %vm1065_vm13, %v1066_v16, %v1751_v36  ;;  %v998_v59 = vand.u32 3, %v997_v27 }
 0x27a   :  { %v976_v25 = vsub.s32 32, %v975_v56  ;;  %v980_v32 = vsub.s32 4294967266, %v975_v56  ;;  %v977_v42 = vshll.u32 %v968_v26, %v975_v56  ;;  %v1068_v23 = vadd.s32 %v1067_v9, %v1063_v7 }
 0x27b   :  { %vm1003_vm1 = vcmp.eq.s32.totalorder %v998_v59, 2  ;;  %vm1000_vm2 = vcmp.eq.s32.totalorder %v998_v59, 0  ;;  %vm999_vm3 = vcmp.lt.s32.totalorder %v998_v59, 2 }
 0x27c   :  { %v978_v0 = vshrl.u32 %v960_v34, %v976_v25  ;;  %v981_v4 = vadd.s32 127, %v980_v32  ;;  %v1069_v35 = vadd.s32 536870912, %v1068_v23 }
 0x27e   :  { %v979_v10 = vor.u32 %v978_v0, %v977_v42  ;;  %v982_v29 = vshll.u32 %v981_v4, 23  ;;  %v1070_v33 = vshrl.u32 %v1069_v35, 30 }
 0x280   :  { %v983_v11 = vor.u32 4788187, %v982_v29  ;;  %v986_v13 = vcvt.s32.f32 %v979_v10  ;;  %v1071_v5 = vshll.u32 %v1070_v33, 30  ;;  %v1094_v62 = vsub.s32 4, %v1070_v33 }
 0x282   :  { %v984_v44 = vand.u32 2147483647, %v983_v11  ;;  %v1072_v47 = vsub.s32 %v1068_v23, %v1071_v5  ;;  %v1095_v56 = vsel %vm1010_vm5, %v1094_v62, %v1070_v33 }
 0x284   :  { %v987_v8 = vmul.f32 %v986_v13, %v984_v44  ;;  %v1074_v26 = vsub.s32 0, %v1072_v47 }
 0x286   :  { %v988_v17 = vxor.u32 2147483648, %v987_v8  ;;  %v1157_v37 = vmin.u32 %v1074_v26, %v1072_v47 }
 0x288   :  { %v989_v20 = vsel %vm906_vm14, %v988_v17, %v987_v8  ;;  %v1076_v18 = vclz %v1157_v37 }
 0x289   :  { %v992_v60 = vsel %vm905_vm15, %v1692_v6, %v989_v20  ;;  %v1097_v6 = vsel %vm1009_vm6, 0, %v1095_v56 }
 0x28a   :  { %1247 = vcosq.f32 %v992_v60  ;;  %v1158_v21 = vadd.s32 4294967294, %v1076_v18  ;;  %v1101_v34 = vadd.s32 3, %v1097_v6 }
 0x28b   :  { %1249 = vsinq.f32 %v992_v60 }
 0x28c   :  { %vm1159_vm0 = vcmp.lt.s32.totalorder %v1158_v21, 0  ;;  %v1102_v25 = vand.u32 3, %v1101_v34 }
 0x28d   :  { %v1079_v49 = vsel %vm1159_vm0, 0, %v1158_v21 }
 0x28e   :  { %v1080_v40 = vsub.s32 32, %v1079_v49  ;;  %v1084_v53 = vsub.s32 4294967266, %v1079_v49  ;;  %v1081_v61 = vshll.u32 %v1072_v47, %v1079_v49  ;;  %vm1107_vm7 = vcmp.eq.s32.totalorder %v1102_v25, 2 }
 0x28f   :  { %vm1104_vm8 = vcmp.eq.s32.totalorder %v1102_v25, 0  ;;  %vm1103_vm9 = vcmp.lt.s32.totalorder %v1102_v25, 2 }
 0x290   :  { %v1082_v46 = vshrl.u32 %v1064_v52, %v1080_v40  ;;  %v1085_v51 = vadd.s32 127, %v1084_v53 }
 0x292   :  { %v1083_v57 = vor.u32 %v1082_v46, %v1081_v61  ;;  %v1086_v50 = vshll.u32 %v1085_v51, 23 }
 0x294   :  { %v1248_v12 = vpop.eup %1247  ;;  %v1087_v58 = vor.u32 4788187, %v1086_v50  ;;  %v1090_v43 = vcvt.s32.f32 %v1083_v57 }
 0x295   :  { %v1250_v24 = vpop.eup %1249  ;;  %v1004_v28 = vxor.u32 2147483648, %v1248_v12 }
 0x296   :  { %v1001_v39 = vxor.u32 2147483648, %v1250_v24  ;;  %v1088_v19 = vand.u32 2147483647, %v1087_v58 }
 0x297   :  { %v1005_v15 = vsel %vm1003_vm1, %v1004_v28, %v1250_v24 }
 0x298   :  { %v1002_v22 = vsel %vm1000_vm2, %v1248_v12, %v1001_v39  ;;  %v1091_v30 = vmul.f32 %v1090_v43, %v1088_v19 }
 0x299   :  { %v1006_v38 = vsel %vm999_vm3, %v1002_v22, %v1005_v15 }
 0x29a   :  { %v1007_v1 = vsel %vm996_vm4, nan, %v1006_v38  ;;  %v1092_v48 = vxor.u32 2147483648, %v1091_v30 }
 0x29b   :  { %v1112_v2 = vmul.f32 %v1007_v1, %v1674_v31 }
 0x29c   :  { %v1093_v36 = vsel %vm1010_vm5, %v1092_v48, %v1091_v30 }
 0x29d   :  { %v1096_v45 = vsel %vm1009_vm6, %v1713_v54, %v1093_v36 }
 0x29e   :  { %1251 = vcosq.f32 %v1096_v45 }
 0x29f   :  { %1253 = vsinq.f32 %v1096_v45 }
 0x2a8   :  { %v1252_v32 = vpop.eup %1251 }
 0x2a9   :  { %v1254_v16 = vpop.eup %1253  ;;  %v1108_v31 = vxor.u32 2147483648, %v1252_v32 }
 0x2aa   :  { %v1105_v42 = vxor.u32 2147483648, %v1254_v16 }
 0x2ab   :  { %v1109_v0 = vsel %vm1107_vm7, %v1108_v31, %v1254_v16 }
 0x2ac   :  { %v1106_v4 = vsel %vm1104_vm8, %v1252_v32, %v1105_v42 }
 0x2ad   :  { %v1110_v63 = vsel %vm1103_vm9, %v1106_v4, %v1109_v0 }
 0x2ae   :  { %v1111_v7 = vsel %vm1100_vm10, nan, %v1110_v63 }
 0x2af   :  { %v1113_v9 = vmul.f32 %v1111_v7, %v1684_v55 }
 0x2b1   :  { %v1114_v10 = vadd.f32 %v1113_v9, %v1112_v2 }
 0x2b3   :  { %v1115_v29 = vrot.slane %v1114_v10, 4 }
 0x2b5   :  { %v1116_v23 = vadd.f32 %v1115_v29, %v1114_v10 }
 0x2b7   :  { %v1117_v11 = vrot.slane %v1116_v23, 2 }
 0x2b9   :  { %v1118_v35 = vadd.f32 %v1117_v11, %v1116_v23 }
 0x2bb   :  { %v1119_v44 = vrot.slane %v1118_v35, 1 }
 0x2bd   :  { %v1120_v13 = vadd.f32 %v1119_v44, %v1118_v35 }
 0x2bf   :  { %1121 = vst [vmem:[#allocation2] sm:$0x1] %v1120_v13 }
 0x2c0   :  { %1266 = shalt.err (!%p1263_p4)
}
 0x2c1   :  { %s1267_s29 = scalar_lea.hbm %s1790_s5, 16 }
 0x2c2   :  { %p1268_p5 = scmp.ne.s32.totalorder %s1790_s5, %s1267_s29  ;;  %p1271_p6 = scmp.lt.u32.totalorder %s1267_s29, %s1790_s5 }
 0x2c4   :  { %p1273_p7 = pnand %p1271_p6, %p1268_p5 }
 0x2c6   :  { %1276 = shalt.err (!%p1273_p7)
}
 0x2c7   :  { %1131 = dma.vmem_to_hbm [thread:$0]  %s1129_s25, 16, %s1790_s5, [#allocation3]  }
 0x2c8   :  { %1277 = dma.done.wait [#allocation3], 16  }
 0x2c9   :  { %1278 = vsyncadd [#allocation3], 4294967280 }
 0x2ca   :  { %1135 = vsyncpa [#allocation3], 1 }

</bundles_post_ra>
